<compile_context>
chip_gen: v7x
topology: tpu7x:2x2x1
jax: 0.10.0
libtpu: 0.0.40
codegen_flags: <defaults>
</compile_context>

<pallas_src>
import jax
import jax.numpy as jnp
from jax.experimental import pallas as pl
from jax.experimental.pallas import tpu as pltpu

_LANES = 128
_SUBLANES = 8
_BLOCK_BYTES = 2 * 1024 * 1024       # per-operand block budget (v5e-safe)
_MIN_ROW_BLOCKS = 8                  # target grid length for megacore sharding
_MIN_BLOCK_BYTES = 256 * 1024        # don't shrink blocks below this for it


def _simple_with_leaf_kernel(w_ref, x_ref, o_ref):
    # Elementwise hot path on the VPU, entirely in VMEM: weight + input + 1.
    o_ref[...] = w_ref[...] + x_ref[...] + 1.0


def _choose_tiles(N, M, itemsize):
    """Pick (tn, tm): full-M contiguous row blocks when possible."""
    if _SUBLANES * M * itemsize <= _BLOCK_BYTES:
        # Common case: an 8-row full-width slab fits -> keep full M per block.
        tm = M
    else:
        # Giant-M fallback: tile M with a lane-aligned width.
        tm = max(_LANES, ((_BLOCK_BYTES // (_SUBLANES * itemsize)) // _LANES) * _LANES)

    tn = _BLOCK_BYTES // (tm * itemsize)
    if tn >= N:
        tn = N                        # full extent (always a legal block dim)
    else:
        tn = max(_SUBLANES, (tn // _SUBLANES) * _SUBLANES)

    # Megacore heuristic (v7x): make sure the leading parallel axis has enough
    # blocks for both TensorCores, as long as blocks stay substantial.
    while tn > _SUBLANES and pl.cdiv(N, tn) < _MIN_ROW_BLOCKS:
        half = max(_SUBLANES, ((tn // 2) // _SUBLANES) * _SUBLANES)
        if half == tn or half * tm * itemsize < _MIN_BLOCK_BYTES:
            break
        tn = half
    return tn, tm


def _tiled_add_plus_one(weight: jax.Array, x: jax.Array) -> jax.Array:
    N, M = weight.shape
    tn, tm = _choose_tiles(N, M, weight.dtype.itemsize)

    if tm == M:
        # 1-D grid over rows: every block is one contiguous HBM range.
        grid = (pl.cdiv(N, tn),)
        index_map = lambda i: (i, 0)
        dim_sem = ("parallel",)
    else:
        # Giant-M fallback: 2-D grid, rows leading so megacore sharding splits
        # the larger axis.
        grid = (pl.cdiv(N, tn), pl.cdiv(M, tm))
        index_map = lambda i, j: (i, j)
        dim_sem = ("parallel", "parallel")

    return pl.pallas_call(
        _simple_with_leaf_kernel,
        out_shape=jax.ShapeDtypeStruct((N, M), weight.dtype),
        grid=grid,
        in_specs=[
            pl.BlockSpec((tn, tm), index_map),
            pl.BlockSpec((tn, tm), index_map),
        ],
        out_specs=pl.BlockSpec((tn, tm), index_map),
        compiler_params=pltpu.CompilerParams(
            # No reduction / carried state: all axes independent. Lets v7x
            # shard the grid across both TensorCores; harmless on v5e/v6e.
            dimension_semantics=dim_sem,
        ),
    )(weight, x)


def _lane_dense_width(total: int):
    """Widest lane-dense slab width (multiple of 128) dividing `total`."""
    for m2 in (8192, 4096, 2048, 1024, 512, 256, _LANES):
        if total % m2 == 0:
            return m2
    return None


def simple_with_leaf(weight: jax.Array, x: jax.Array) -> jax.Array:
    assert weight.shape == x.shape, "weight and input must have the same (N, M) shape"
    assert weight.ndim == 2, "SimpleWithLeaf uses 2-D (N, M) tensors"
    orig_shape = weight.shape
    N, M = orig_shape

    # Layout plumbing: if the last dim is not lane-dense (multiple of 128) but
    # the flat size is, reshape to the widest lane-dense 2-D slab so stores are
    # wide unmasked vst instead of masked partial stores.
    if M % _LANES != 0:
        m2 = _lane_dense_width(N * M)
        if m2 is not None:
            weight = weight.reshape(N * M // m2, m2)
            x = x.reshape(N * M // m2, m2)

    out = _tiled_add_plus_one(weight, x)
    return out.reshape(orig_shape)


if __name__ == "__main__":
    key = jax.random.PRNGKey(0)

    # Module init: self.weight = nn.Parameter(torch.rand(N, M)) -> uniform [0, 1).
    # Primary small demo shape (one vreg).
    N, M = 8, 128
    k_w, k_x, k2_w, k2_x, k3_w, k3_x = jax.random.split(key, 6)
    weight = jax.random.uniform(k_w, (N, M), dtype=jnp.float32)
    x = jax.random.uniform(k_x, (N, M), dtype=jnp.float32)

    out = jax.block_until_ready(simple_with_leaf(weight, x))
    ref = weight + (x + 1.0)
    assert jnp.allclose(out, ref, atol=1e-6), "mismatch vs reference (8x128)"

    # Secondary check: exercises the multi-block row-tiled path (grid (8,)).
    w2 = jax.random.uniform(k2_w, (1024, 2048), dtype=jnp.float32)
    x2 = jax.random.uniform(k2_x, (1024, 2048), dtype=jnp.float32)
    out2 = jax.block_until_ready(simple_with_leaf(w2, x2))
    assert jnp.allclose(out2, w2 + x2 + 1.0, atol=1e-6), "mismatch vs reference (1024x2048)"

    # Tertiary check: non-lane-dense last dim -> widest lane-dense reshape path.
    w3 = jax.random.uniform(k3_w, (16, 96), dtype=jnp.float32)
    x3 = jax.random.uniform(k3_x, (16, 96), dtype=jnp.float32)
    out3 = jax.block_until_ready(simple_with_leaf(w3, x3))
    assert jnp.allclose(out3, w3 + x3 + 1.0, atol=1e-6), "mismatch vs reference (16x96)"

    print("KERNEL_OK")
</pallas_src>

<mosaic_0001>
module attributes {stable_mosaic.version = 11 : i64} {
  func.func @_simple_with_leaf_kernel(%arg0: i32, %arg1: memref<8x128xf32, #tpu.memory_space<vmem>>, %arg2: memref<8x128xf32, #tpu.memory_space<vmem>>, %arg3: memref<8x128xf32, #tpu.memory_space<vmem>>) attributes {dimension_semantics = [#tpu.dimension_semantics<parallel>], iteration_bounds = array<i64: 1>, scalar_prefetch = 0 : i64, scratch_operands = 0 : i64, tpu.core_type = #tpu.core_type<tc>, window_params = [{transform_indices = @transform_0, window_bounds = array<i64: 8, 128>}, {transform_indices = @transform_1, window_bounds = array<i64: 8, 128>}, {transform_indices = @transform_2, window_bounds = array<i64: 8, 128>}]} {
    %c0 = arith.constant 0 : index
    %c0_0 = arith.constant 0 : index
    %0 = vector.load %arg1[%c0, %c0_0] : memref<8x128xf32, #tpu.memory_space<vmem>>, vector<8x128xf32>
    %c0_1 = arith.constant 0 : index
    %c0_2 = arith.constant 0 : index
    %1 = vector.load %arg2[%c0_1, %c0_2] : memref<8x128xf32, #tpu.memory_space<vmem>>, vector<8x128xf32>
    %2 = arith.addf %0, %1 : vector<8x128xf32>
    %cst = arith.constant 1.000000e+00 : f32
    %3 = vector.broadcast %cst : f32 to vector<8x128xf32>
    %4 = arith.addf %2, %3 : vector<8x128xf32>
    %c0_3 = arith.constant 0 : index
    %c0_4 = arith.constant 0 : index
    %5 = vector.load %arg3[%c0_3, %c0_4] : memref<8x128xf32, #tpu.memory_space<vmem>>, vector<8x128xf32>
    tpu.vector_store %arg3[%c0_3, %c0_4], %4 {strides = array<i32>} : memref<8x128xf32, #tpu.memory_space<vmem>>, vector<8x128xf32>,
    return
  }
  func.func @transform_0(%arg0: i32) -> (i32, i32) {
    %c0_i32 = arith.constant 0 : i32
    %c0_i32_0 = arith.constant 0 : i32
    return %arg0, %c0_i32 : i32, i32
  }
  func.func @transform_1(%arg0: i32) -> (i32, i32) {
    %c0_i32 = arith.constant 0 : i32
    %c0_i32_0 = arith.constant 0 : i32
    return %arg0, %c0_i32 : i32, i32
  }
  func.func @transform_2(%arg0: i32) -> (i32, i32) {
    %c0_i32 = arith.constant 0 : i32
    %c0_i32_0 = arith.constant 0 : i32
    return %arg0, %c0_i32 : i32, i32
  }
}

</mosaic_0001>

<bundles_post_ra>
// kernel: tpu_custom_call.1
= control target key start
LH: loop header
LB: loop body
LE: loop exit
PB: predicated region body
PF: predicated region fallthrough
CT: control target
= control target key end

     0   :  { %7 = vsyncpa [#allocation3], 0  ;;  %s186_s0 = inlined_call_operand.hbm [shape: f32[8,128], index: 0, kind: input, shape index: {}]   ;;  %s187_s1 = inlined_call_operand.hbm [shape: f32[8,128], index: 1, kind: input, shape index: {}]   ;;  %s188_s2 = inlined_call_operand.hbm [shape: f32[8,128], index: 2, kind: output, shape index: {}]  }
   0x1   :  { %8 = vsyncpa [#allocation6], 0 }
   0x2   :  { %9 = vsyncpa [#allocation4], 0  ;;  %s132_s9 = smov [#allocation2]   ;;  %s133_s11 = smov [#allocation5]  }
   0x3   :  { %s16_s10 = sshll.u32 %s132_s9, 4  ;;  %s26_s12 = sshll.u32 %s133_s11, 4  ;;  %s17_s10 = int_to_ptr.vmem [resolvable:$true] %s16_s10  ;;  %s27_s12 = int_to_ptr.vmem [resolvable:$true] %s26_s12 }
   0x4   :  { %s60_s15 = scalar_lea.hbm %s186_s0, 128 }
   0x5   :  { %p61_p0 = scmp.ne.s32.totalorder %s186_s0, %s60_s15  ;;  %p64_p1 = scmp.lt.u32.totalorder %s60_s15, %s186_s0 }
   0x7   :  { %p66_p2 = pnand %p64_p1, %p61_p0 }
   0x9   :  { %69 = shalt.err (!%p66_p2)
}
   0xa   :  { %s70_s20 = scalar_lea.vmem %s17_s10, 128  ;;  %p75_p4 = scmp.lt.s32.totalorder %s17_s10, %s17_s10 }
   0xb   :  { %p71_p3 = scmp.ne.s32.totalorder %s17_s10, %s70_s20  ;;  %p76_p5 = scmp.lt.s32.totalorder %s70_s20, %s70_s20 }
   0xd   :  { %p77_p6 = por %p76_p5, %p75_p4 }
   0xf   :  { %p78_p7 = pnand %p77_p6, %p71_p3 }
  0x11   :  { %81 = shalt.err (!%p78_p7)
}
  0x12   :  { %19 = dma.hbm_to_vmem [thread:$0]  %s186_s0, 128, %s17_s10, [#allocation3]  }
  0x13   :  { %s82_s25 = scalar_lea.hbm %s187_s1, 128 }
  0x14   :  { %p83_p8 = scmp.ne.s32.totalorder %s187_s1, %s82_s25  ;;  %p86_p9 = scmp.lt.u32.totalorder %s82_s25, %s187_s1 }
  0x16   :  { %p88_p10 = pnand %p86_p9, %p83_p8 }
  0x18   :  { %91 = shalt.err (!%p88_p10)
}
  0x19   :  { %s92_s30 = scalar_lea.vmem %s27_s12, 128  ;;  %p97_p12 = scmp.lt.s32.totalorder %s27_s12, %s27_s12 }
  0x1a   :  { %p93_p11 = scmp.ne.s32.totalorder %s27_s12, %s92_s30  ;;  %p98_p13 = scmp.lt.s32.totalorder %s92_s30, %s92_s30 }
  0x1c   :  { %p99_p0 = por %p98_p13, %p97_p12 }
  0x1e   :  { %p100_p1 = pnand %p99_p0, %p93_p11 }
  0x20   :  { %103 = shalt.err (!%p100_p1)
}
  0x21   :  { %29 = dma.hbm_to_vmem [thread:$0]  %s187_s1, 128, %s27_s12, [#allocation6]  }
  0x22   :  { %126 = dma.done.wait [#allocation3], 128  }
  0x23   :  { %127 = vsyncadd [#allocation3], 4294967168 }
  0x24   :  { %128 = dma.done.wait [#allocation6], 128  }
  0x25   :  { %129 = vsyncadd [#allocation6], 4294967168  ;;  %v36_v0 = vld [vmem:[#allocation2] sm:$0xff]  ;;  %v37_v1 = vld [vmem:[#allocation5] sm:$0xff]  ;;  %s134_s4 = smov [#allocation7]  }
  0x26   :  { %s47_s5 = sshll.u32 %s134_s4, 4  ;;  %v38_v2 = vadd.f32 %v37_v1, %v36_v0  ;;  %s48_s5 = int_to_ptr.vmem [resolvable:$true] %s47_s5 }
  0x27   :  { %s104_s6 = scalar_lea.vmem %s48_s5, 128  ;;  %p109_p3 = scmp.lt.s32.totalorder %s48_s5, %s48_s5 }
  0x28   :  { %v39_v3 = vadd.f32 1.0, %v38_v2  ;;  %p105_p2 = scmp.ne.s32.totalorder %s48_s5, %s104_s6  ;;  %p110_p4 = scmp.lt.s32.totalorder %s104_s6, %s104_s6 }
  0x2a   :  { %40 = vst [vmem:[#allocation7] sm:$0xff] %v39_v3  ;;  %p111_p5 = por %p110_p4, %p109_p3 }
  0x2c   :  { %p112_p6 = pnand %p111_p5, %p105_p2 }
  0x2e   :  { %115 = shalt.err (!%p112_p6)
}
  0x2f   :  { %s116_s8 = scalar_lea.hbm %s188_s2, 128 }
  0x30   :  { %p117_p7 = scmp.ne.s32.totalorder %s188_s2, %s116_s8  ;;  %p120_p8 = scmp.lt.u32.totalorder %s116_s8, %s188_s2 }
  0x32   :  { %p122_p9 = pnand %p120_p8, %p117_p7 }
  0x34   :  { %125 = shalt.err (!%p122_p9)
}
  0x35   :  { %50 = dma.vmem_to_hbm [thread:$0]  %s48_s5, 128, %s188_s2, [#allocation4]  }
  0x36   :  { %130 = dma.done.wait [#allocation4], 128  }
  0x37   :  { %131 = vsyncadd [#allocation4], 4294967168 }
  0x38   :  { %54 = vsyncpa [#allocation3], 1 }
  0x39   :  { %55 = vsyncpa [#allocation6], 1 }
  0x3a   :  { %56 = vsyncpa [#allocation4], 1 }

</bundles_post_ra>
